<compile_context>
chip_gen: v6e
topology: v6e:2x2x1
jax: 0.10.0
libtpu: 0.0.40
codegen_flags: <defaults>
</compile_context>

<pallas_src>
import jax
import jax.numpy as jnp
from jax.experimental import pallas as pl
from jax.experimental.pallas import tpu as pltpu

DROPOUT1 = 0.2
DROPOUT2 = 0.5
LANE = 128


def _round_up(n, m):
    return ((n + m - 1) // m) * m


def mlp_dropout_kernel(x_ref, u1_ref, u2_ref,
                       w1_ref, b1_ref, w2_ref, b2_ref, w3_ref, b3_ref,
                       out_ref):
    """One batch tile of Net.forward (training path).

    x_ref  : (TM, nums_inputs)  bf16
    u*_ref : (TM, hidden*)      f32 uniforms in [0,1) for the dropout masks
    w*_ref : (in, out)          bf16, resident across all grid steps
    b*_ref : (1, out)           f32
    out_ref: (TM, out_pad)      f32, out_pad is a multiple of 128 (lane-dense)
    """
    # ---- Layer 1: Linear -> ReLU -> dropout_layer(p=0.2) ----
    h1 = jnp.dot(x_ref[...], w1_ref[...],
                 preferred_element_type=jnp.float32) + b1_ref[...]
    h1 = jnp.maximum(h1, 0.0)
    # Reproduces the reference bug `mask * X / 1 - dropout`:
    #   == where(keep, X, 0) - dropout   (one compare + one vsel on the VPU)
    h1 = jnp.where(u1_ref[...] > jnp.float32(DROPOUT1), h1, 0.0) - jnp.float32(DROPOUT1)

    # ---- Layer 2: Linear -> ReLU -> dropout_layer(p=0.5) ----
    h2 = jnp.dot(h1.astype(jnp.bfloat16), w2_ref[...],
                 preferred_element_type=jnp.float32) + b2_ref[...]
    h2 = jnp.maximum(h2, 0.0)
    h2 = jnp.where(u2_ref[...] > jnp.float32(DROPOUT2), h2, 0.0) - jnp.float32(DROPOUT2)

    # ---- Layer 3: Linear (no activation) ----
    out_ref[...] = (jnp.dot(h2.astype(jnp.bfloat16), w3_ref[...],
                            preferred_element_type=jnp.float32) + b3_ref[...])


def net_forward(x, params, key, *, is_training=True, tm_max=512):
    """x: [batch, nums_inputs] f32.  params: dict of (in,out) weights + (1,out) biases."""
    # TODO(synk): inference path (is_training=False) would skip the dropout
    # select/shift; only the training path is exercised, matching the
    # reference default is_Training=True.
    del is_training

    nums_inputs = params["w1"].shape[0]
    x = x.reshape(-1, nums_inputs).astype(jnp.float32)  # X.reshape((-1, nums_inputs))
    batch = x.shape[0]
    h1 = params["w1"].shape[1]
    h2 = params["w2"].shape[1]
    nums_outputs = params["w3"].shape[1]

    # Lane-dense output: pad the last layer to a multiple of 128 columns so the
    # output stores are full (unmasked) vst's; slice back after the kernel.
    out_pad = _round_up(nums_outputs, LANE)

    # Batch tiling: largest tile up to tm_max rows, multiple of 8 sublanes.
    tm = min(tm_max, _round_up(batch, 8))
    padded_batch = _round_up(batch, tm)
    grid = (padded_batch // tm,)

    def pad_rows(a):
        if a.shape[0] == padded_batch:
            return a
        return jnp.pad(a, ((0, padded_batch - a.shape[0]), (0, 0)))

    # bf16 matmul operands (f32 accumulation on the MXU); biases stay f32.
    x_in = pad_rows(x).astype(jnp.bfloat16)
    w1 = params["w1"].astype(jnp.bfloat16)
    w2 = params["w2"].astype(jnp.bfloat16)
    w3 = jnp.pad(params["w3"], ((0, 0), (0, out_pad - nums_outputs))).astype(jnp.bfloat16)
    b1 = params["b1"].astype(jnp.float32)
    b2 = params["b2"].astype(jnp.float32)
    b3 = jnp.pad(params["b3"], ((0, 0), (0, out_pad - nums_outputs))).astype(jnp.float32)

    # Dropout randomness generated outside the kernel (works on TPU and in
    # interpret mode; the kernel only does a compare + select per element).
    k1, k2 = jax.random.split(key)
    u1 = jax.random.uniform(k1, (padded_batch, h1), jnp.float32)
    u2 = jax.random.uniform(k2, (padded_batch, h2), jnp.float32)

    row_spec = lambda feat: pl.BlockSpec((tm, feat), lambda i: (i, 0))
    resident = lambda r, c: pl.BlockSpec((r, c), lambda i: (0, 0))  # weights pinned in VMEM

    out = pl.pallas_call(
        mlp_dropout_kernel,
        out_shape=jax.ShapeDtypeStruct((padded_batch, out_pad), jnp.float32),
        grid=grid,
        in_specs=[
            row_spec(nums_inputs),            # x tile
            row_spec(h1),                     # dropout uniforms, layer 1
            row_spec(h2),                     # dropout uniforms, layer 2
            resident(nums_inputs, h1), resident(1, h1),
            resident(h1, h2), resident(1, h2),
            resident(h2, out_pad), resident(1, out_pad),
        ],
        out_specs=row_spec(out_pad),
        compiler_params=pltpu.CompilerParams(
            # Batch axis is embarrassingly parallel -> megacore sharding on v7x.
            dimension_semantics=("parallel",),
            # Safe on v5e/v6e/v7x; raise if tm_max / feature widths grow.
            vmem_limit_bytes=32 * 1024 * 1024,
        ),
    )(x_in, u1, u2, w1, b1, w2, b2, w3, b3)

    return out[:batch, :nums_outputs]


def init_params(key, nums_inputs, nums_hiddens1, nums_hiddens2, nums_outputs):
    """Deterministic synthetic init (Kaiming-ish scaling like nn.Linear default)."""
    ks = jax.random.split(key, 6)

    def linear(kw, kb, fan_in, fan_out):
        bound = 1.0 / jnp.sqrt(fan_in)
        # Stored as [in, out] so the kernel computes x @ W + b (== x @ W.T + b in torch).
        w = jax.random.uniform(kw, (fan_in, fan_out), jnp.float32, -bound, bound)
        b = jax.random.uniform(kb, (1, fan_out), jnp.float32, -bound, bound)
        return w, b

    w1, b1 = linear(ks[0], ks[1], nums_inputs, nums_hiddens1)
    w2, b2 = linear(ks[2], ks[3], nums_hiddens1, nums_hiddens2)
    w3, b3 = linear(ks[4], ks[5], nums_hiddens2, nums_outputs)
    return {"w1": w1, "b1": b1, "w2": w2, "b2": b2, "w3": w3, "b3": b3}


if __name__ == "__main__":
    # Small shapes consistent with the MLP: batch=8, inputs=32, hidden1=64,
    # hidden2=32, outputs=16.
    batch, nums_inputs, nums_hiddens1, nums_hiddens2, nums_outputs = 8, 32, 64, 32, 16

    key = jax.random.PRNGKey(0)
    k_x, k_p, k_drop = jax.random.split(key, 3)
    x = jax.random.normal(k_x, (batch, nums_inputs), dtype=jnp.float32)
    params = init_params(k_p, nums_inputs, nums_hiddens1, nums_hiddens2, nums_outputs)

    out = net_forward(x, params, k_drop, is_training=True)
    out = jax.block_until_ready(out)
    assert out.shape == (batch, nums_outputs) and out.dtype == jnp.float32
    print("KERNEL_OK")
</pallas_src>

<mosaic_0001>
module attributes {stable_mosaic.version = 11 : i64} {
  func.func @mlp_dropout_kernel(%arg0: i32, %arg1: memref<8x32xbf16, #tpu.memory_space<vmem>>, %arg2: memref<8x64xf32, #tpu.memory_space<vmem>>, %arg3: memref<8x32xf32, #tpu.memory_space<vmem>>, %arg4: memref<32x64xbf16, #tpu.memory_space<vmem>>, %arg5: memref<1x64xf32, #tpu.memory_space<vmem>>, %arg6: memref<64x32xbf16, #tpu.memory_space<vmem>>, %arg7: memref<1x32xf32, #tpu.memory_space<vmem>>, %arg8: memref<32x128xbf16, #tpu.memory_space<vmem>>, %arg9: memref<1x128xf32, #tpu.memory_space<vmem>>, %arg10: memref<8x128xf32, #tpu.memory_space<vmem>>) attributes {dimension_semantics = [#tpu.dimension_semantics<parallel>], iteration_bounds = array<i64: 1>, scalar_prefetch = 0 : i64, scratch_operands = 0 : i64, tpu.core_type = #tpu.core_type<tc>, window_params = [{transform_indices = @transform_0, window_bounds = array<i64: 8, 32>}, {transform_indices = @transform_1, window_bounds = array<i64: 8, 64>}, {transform_indices = @transform_2, window_bounds = array<i64: 8, 32>}, {pipeline_mode = #tpu.pipeline_mode<synchronous>, transform_indices = @transform_3, window_bounds = array<i64: 32, 64>}, {pipeline_mode = #tpu.pipeline_mode<synchronous>, transform_indices = @transform_4, window_bounds = array<i64: 1, 64>}, {pipeline_mode = #tpu.pipeline_mode<synchronous>, transform_indices = @transform_5, window_bounds = array<i64: 64, 32>}, {pipeline_mode = #tpu.pipeline_mode<synchronous>, transform_indices = @transform_6, window_bounds = array<i64: 1, 32>}, {pipeline_mode = #tpu.pipeline_mode<synchronous>, transform_indices = @transform_7, window_bounds = array<i64: 32, 128>}, {pipeline_mode = #tpu.pipeline_mode<synchronous>, transform_indices = @transform_8, window_bounds = array<i64: 1, 128>}, {transform_indices = @transform_9, window_bounds = array<i64: 8, 128>}]} {
    %c0 = arith.constant 0 : index
    %c0_0 = arith.constant 0 : index
    %0 = vector.load %arg1[%c0, %c0_0] : memref<8x32xbf16, #tpu.memory_space<vmem>>, vector<8x32xbf16>
    %c0_1 = arith.constant 0 : index
    %c0_2 = arith.constant 0 : index
    %1 = vector.load %arg4[%c0_1, %c0_2] : memref<32x64xbf16, #tpu.memory_space<vmem>>, vector<32x64xbf16>
    %cst = arith.constant dense<0.000000e+00> : vector<8x64xf32>
    %2 = tpu.matmul %0, %1, %cst {dimension_numbers = #tpu.dot_dimension_numbers<[1], [0], [0], [1], [0, 0, 1, 1], [], []>} : vector<8x32xbf16>, vector<32x64xbf16>, vector<8x64xf32> -> vector<8x64xf32>
    %c0_3 = arith.constant 0 : index
    %c0_4 = arith.constant 0 : index
    %3 = vector.load %arg5[%c0_3, %c0_4] : memref<1x64xf32, #tpu.memory_space<vmem>>, vector<1x64xf32>
    %4 = vector.broadcast %3 : vector<1x64xf32> to vector<8x64xf32>
    %5 = arith.addf %2, %4 : vector<8x64xf32>
    %cst_5 = arith.constant 0.000000e+00 : f32
    %6 = vector.broadcast %cst_5 : f32 to vector<8x64xf32>
    %7 = arith.maximumf %5, %6 : vector<8x64xf32>
    %c0_6 = arith.constant 0 : index
    %c0_7 = arith.constant 0 : index
    %8 = vector.load %arg2[%c0_6, %c0_7] : memref<8x64xf32, #tpu.memory_space<vmem>>, vector<8x64xf32>
    %cst_8 = arith.constant 2.000000e-01 : f32
    %9 = vector.broadcast %cst_8 : f32 to vector<8x64xf32>
    %10 = arith.cmpf ogt, %8, %9 : vector<8x64xf32>
    %cst_9 = arith.constant 0.000000e+00 : f32
    %11 = vector.broadcast %cst_9 : f32 to vector<8x64xf32>
    %12 = arith.select %10, %7, %11 : vector<8x64xi1>, vector<8x64xf32>
    %cst_10 = arith.constant 2.000000e-01 : f32
    %13 = vector.broadcast %cst_10 : f32 to vector<8x64xf32>
    %14 = arith.subf %12, %13 : vector<8x64xf32>
    %15 = arith.truncf %14 : vector<8x64xf32> to vector<8x64xbf16>
    %c0_11 = arith.constant 0 : index
    %c0_12 = arith.constant 0 : index
    %16 = vector.load %arg6[%c0_11, %c0_12] : memref<64x32xbf16, #tpu.memory_space<vmem>>, vector<64x32xbf16>
    %cst_13 = arith.constant dense<0.000000e+00> : vector<8x32xf32>
    %17 = tpu.matmul %15, %16, %cst_13 {dimension_numbers = #tpu.dot_dimension_numbers<[1], [0], [0], [1], [0, 0, 1, 1], [], []>} : vector<8x64xbf16>, vector<64x32xbf16>, vector<8x32xf32> -> vector<8x32xf32>
    %c0_14 = arith.constant 0 : index
    %c0_15 = arith.constant 0 : index
    %18 = vector.load %arg7[%c0_14, %c0_15] : memref<1x32xf32, #tpu.memory_space<vmem>>, vector<1x32xf32>
    %19 = vector.broadcast %18 : vector<1x32xf32> to vector<8x32xf32>
    %20 = arith.addf %17, %19 : vector<8x32xf32>
    %cst_16 = arith.constant 0.000000e+00 : f32
    %21 = vector.broadcast %cst_16 : f32 to vector<8x32xf32>
    %22 = arith.maximumf %20, %21 : vector<8x32xf32>
    %c0_17 = arith.constant 0 : index
    %c0_18 = arith.constant 0 : index
    %23 = vector.load %arg3[%c0_17, %c0_18] : memref<8x32xf32, #tpu.memory_space<vmem>>, vector<8x32xf32>
    %cst_19 = arith.constant 5.000000e-01 : f32
    %24 = vector.broadcast %cst_19 : f32 to vector<8x32xf32>
    %25 = arith.cmpf ogt, %23, %24 : vector<8x32xf32>
    %cst_20 = arith.constant 0.000000e+00 : f32
    %26 = vector.broadcast %cst_20 : f32 to vector<8x32xf32>
    %27 = arith.select %25, %22, %26 : vector<8x32xi1>, vector<8x32xf32>
    %cst_21 = arith.constant 5.000000e-01 : f32
    %28 = vector.broadcast %cst_21 : f32 to vector<8x32xf32>
    %29 = arith.subf %27, %28 : vector<8x32xf32>
    %30 = arith.truncf %29 : vector<8x32xf32> to vector<8x32xbf16>
    %c0_22 = arith.constant 0 : index
    %c0_23 = arith.constant 0 : index
    %31 = vector.load %arg8[%c0_22, %c0_23] : memref<32x128xbf16, #tpu.memory_space<vmem>>, vector<32x128xbf16>
    %cst_24 = arith.constant dense<0.000000e+00> : vector<8x128xf32>
    %32 = tpu.matmul %30, %31, %cst_24 {dimension_numbers = #tpu.dot_dimension_numbers<[1], [0], [0], [1], [0, 0, 1, 1], [], []>} : vector<8x32xbf16>, vector<32x128xbf16>, vector<8x128xf32> -> vector<8x128xf32>
    %c0_25 = arith.constant 0 : index
    %c0_26 = arith.constant 0 : index
    %33 = vector.load %arg9[%c0_25, %c0_26] : memref<1x128xf32, #tpu.memory_space<vmem>>, vector<1x128xf32>
    %34 = vector.broadcast %33 : vector<1x128xf32> to vector<8x128xf32>
    %35 = arith.addf %32, %34 : vector<8x128xf32>
    %c0_27 = arith.constant 0 : index
    %c0_28 = arith.constant 0 : index
    %36 = vector.load %arg10[%c0_27, %c0_28] : memref<8x128xf32, #tpu.memory_space<vmem>>, vector<8x128xf32>
    tpu.vector_store %arg10[%c0_27, %c0_28], %35 {strides = array<i32>} : memref<8x128xf32, #tpu.memory_space<vmem>>, vector<8x128xf32>,
    return
  }
  func.func @transform_0(%arg0: i32) -> (i32, i32) {
    %c0_i32 = arith.constant 0 : i32
    %c0_i32_0 = arith.constant 0 : i32
    return %arg0, %c0_i32 : i32, i32
  }
  func.func @transform_1(%arg0: i32) -> (i32, i32) {
    %c0_i32 = arith.constant 0 : i32
    %c0_i32_0 = arith.constant 0 : i32
    return %arg0, %c0_i32 : i32, i32
  }
  func.func @transform_2(%arg0: i32) -> (i32, i32) {
    %c0_i32 = arith.constant 0 : i32
    %c0_i32_0 = arith.constant 0 : i32
    return %arg0, %c0_i32 : i32, i32
  }
  func.func @transform_3(%arg0: i32) -> (i32, i32) {
    %c0_i32 = arith.constant 0 : i32
    %c0_i32_0 = arith.constant 0 : i32
    %c0_i32_1 = arith.constant 0 : i32
    return %c0_i32, %c0_i32_0 : i32, i32
  }
  func.func @transform_4(%arg0: i32) -> (i32, i32) {
    %c0_i32 = arith.constant 0 : i32
    %c0_i32_0 = arith.constant 0 : i32
    %c0_i32_1 = arith.constant 0 : i32
    return %c0_i32, %c0_i32_0 : i32, i32
  }
  func.func @transform_5(%arg0: i32) -> (i32, i32) {
    %c0_i32 = arith.constant 0 : i32
    %c0_i32_0 = arith.constant 0 : i32
    %c0_i32_1 = arith.constant 0 : i32
    return %c0_i32, %c0_i32_0 : i32, i32
  }
  func.func @transform_6(%arg0: i32) -> (i32, i32) {
    %c0_i32 = arith.constant 0 : i32
    %c0_i32_0 = arith.constant 0 : i32
    %c0_i32_1 = arith.constant 0 : i32
    return %c0_i32, %c0_i32_0 : i32, i32
  }
  func.func @transform_7(%arg0: i32) -> (i32, i32) {
    %c0_i32 = arith.constant 0 : i32
    %c0_i32_0 = arith.constant 0 : i32
    %c0_i32_1 = arith.constant 0 : i32
    return %c0_i32, %c0_i32_0 : i32, i32
  }
  func.func @transform_8(%arg0: i32) -> (i32, i32) {
    %c0_i32 = arith.constant 0 : i32
    %c0_i32_0 = arith.constant 0 : i32
    %c0_i32_1 = arith.constant 0 : i32
    return %c0_i32, %c0_i32_0 : i32, i32
  }
  func.func @transform_9(%arg0: i32) -> (i32, i32) {
    %c0_i32 = arith.constant 0 : i32
    %c0_i32_0 = arith.constant 0 : i32
    return %arg0, %c0_i32 : i32, i32
  }
}

</mosaic_0001>

<bundles_post_ra>
// kernel: tpu_custom_call.1
= control target key start
LH: loop header
LB: loop body
LE: loop exit
PB: predicated region body
PF: predicated region fallthrough
CT: control target
= control target key end

     0   :  { %14 = vsyncpa [#allocation3], 0  ;;  %s506_s0 = inlined_call_operand.hbm [shape: bf16[8,32], index: 0, kind: input, shape index: {}]   ;;  %s507_s1 = inlined_call_operand.vmem [shape: f32[8,64], index: 1, kind: input, shape index: {}]   ;;  %s508_s2 = inlined_call_operand.vmem [shape: f32[8,32], index: 2, kind: input, shape index: {}]   ;;  %s509_s3 = inlined_call_operand.vmem [shape: bf16[32,64], index: 3, kind: input, shape index: {}]   ;;  %s510_s4 = inlined_call_operand.vmem [shape: f32[1,64], index: 4, kind: input, shape index: {}]   ;;  %s511_s5 = inlined_call_operand.vmem [shape: bf16[64,32], index: 5, kind: input, shape index: {}]   ;;  %s512_s6 = inlined_call_operand.vmem [shape: f32[1,32], index: 6, kind: input, shape index: {}]   ;;  %s513_s7 = inlined_call_operand.vmem [shape: bf16[32,128], index: 7, kind: input, shape index: {}]   ;;  %s514_s8 = inlined_call_operand.vmem [shape: f32[1,128], index: 8, kind: input, shape index: {}]   ;;  %s515_s9 = inlined_call_operand.hbm [shape: f32[8,128], index: 9, kind: output, shape index: {}]  }
   0x1   :  { %15 = vsyncpa [#allocation4], 0  ;;  %s402_s30 = smov [#allocation2]  }
   0x2   :  { %s22_s10 = sshll.u32 %s402_s30, 4  ;;  %s23_s10 = int_to_ptr.vmem [resolvable:$true] %s22_s10 }
   0x3   :  { %s366_s11 = scalar_lea.vmem %s23_s10, 64  ;;  %p371_p1 = scmp.lt.s32.totalorder %s23_s10, %s23_s10 }
   0x4   :  { %p367_p0 = scmp.ne.s32.totalorder %s23_s10, %s366_s11  ;;  %p372_p2 = scmp.lt.s32.totalorder %s366_s11, %s366_s11 }
   0x6   :  { %p373_p3 = por %p372_p2, %p371_p1 }
   0x8   :  { %p374_p4 = pnand %p373_p3, %p367_p0 }
   0xa   :  { %377 = shalt.err (!%p374_p4)
}
   0xb   :  { %25 = dma.hbm_to_vmem [thread:$0]  %s506_s0, 64, %s23_s10, [#allocation3]  }
   0xc   :  { %398 = dma.done.wait [#allocation3], 64  }
   0xd   :  { %399 = vsyncadd [#allocation3], 4294967232  ;;  %v403_v0 = vmov 0.0   ;;  %vm404_vm0 = vmmov 0   ;;  %v350_v1 = vld [vmem:[%s509_s3 + $0x8] sm:$0xff]   ;;  %v351_v2 = vld [vmem:[%s509_s3] sm:$0xff]  }
   0xe   :  { %318 = vmatprep.subr.bf16.mxu0 %v403_v0  ;;  %322 = vmatprep.mubr.msk.bf16.mxu0 %vm404_vm0, %v403_v0  ;;  %v352_v3 = vld [vmem:[%s511_s5 + $0x18] sm:$0xff]   ;;  %v46_v4 = vld [vmem:[#allocation2] sm:$0xf]  ;;  %vm70_vm1 = vcmask 261120   ;;  %v353_v5 = vld [vmem:[%s511_s5 + $0x10] sm:$0xff]   ;;  %vm159_vm3 = vcmask 523264  }
   0xf   :  { %326 = vmatprep.subr.bf16.mxu1 %v403_v0  ;;  %334 = vmatprep.mubr.msk.bf16.mxu1 %vm404_vm0, %v403_v0  ;;  %v354_v6 = vld [vmem:[%s511_s5 + $0x8] sm:$0xff]   ;;  %v355_v7 = vld [vmem:[%s511_s5] sm:$0xff]  }
  0x10   :  { %319 = vmatpush3.bf16.msra.mxu0 %v350_v1  ;;  %327 = vmatpush3.bf16.msra.mxu1 %v352_v3  ;;  %v291_v8 = vld [vmem:[%s510_s4] ss:$0 sm:$0xff]  ;;  %v356_v19 = vld [vmem:[%s513_s7 + $0x8] sm:$0xff]  }
  0x11   :  { %320 = vmatprep.subr.bf16.mxu0 %v403_v0  ;;  %328 = vmatprep.subr.bf16.mxu1 %v403_v0  ;;  %v115_v9 = vld [vmem:[%s507_s1] sm:$0xff] }
  0x12   :  { %vm116_vm2 = vcmp.gt.f32.partialorder %v115_v9, 0.2  ;;  %v357_v20 = vld [vmem:[%s513_s7] sm:$0xff]  }
  0x13   :  { %v296_v21 = vld [vmem:[%s512_s6] ss:$0 sm:$0xff]  ;;  %s405_s6 = smov [#allocation5]  }
  0x14   :  { %321 = vmatpush3.bf16.msra.mxu0 %v351_v2  ;;  %329 = vmatpush3.bf16.msra.mxu1 %v353_v5  ;;  %v204_v22 = vld [vmem:[%s508_s2] sm:$0xff]  ;;  %s282_s13 = sshll.u32 %s405_s6, 4  ;;  %s283_s13 = int_to_ptr.vmem [resolvable:$true] %s282_s13 }
  0x15   :  { %338 = vmatprep.subr.bf16.mxu0 %v403_v0  ;;  %330 = vmatprep.subr.bf16.mxu1 %v403_v0  ;;  %vm205_vm4 = vcmp.gt.f32.partialorder %v204_v22, 0.5  ;;  %v303_v32 = vld [vmem:[%s514_s8] ss:$0 sm:$0xff]  ;;  %s378_s2 = scalar_lea.vmem %s283_s13, 128  ;;  %p383_p6 = scmp.lt.s32.totalorder %s283_s13, %s283_s13 }
  0x16   :  { %p379_p5 = scmp.ne.s32.totalorder %s283_s13, %s378_s2  ;;  %p384_p7 = scmp.lt.s32.totalorder %s378_s2, %s378_s2 }
  0x17   :  { %323 = vmatmul.mubr.msk.bf16.vlgmr.msra.gmra.mxu0 %vm70_vm1, %v46_v4 }
  0x18   :  { %342 = vmatprep.mubr.msk.bf16.mxu0 %vm404_vm0, %v403_v0  ;;  %331 = vmatpush3.bf16.msra.mxu1 %v354_v6  ;;  %p385_p8 = por %p384_p7, %p383_p6 }
  0x19   :  { %332 = vmatprep.subr.bf16.mxu1 %v403_v0  ;;  %339 = vmatpush3.bf16.msra.mxu0 %v356_v19 }
  0x1a   :  { %340 = vmatprep.subr.bf16.mxu0 %v403_v0  ;;  %p386_p9 = pnand %p385_p8, %p379_p5 }
  0x1c   :  { %333 = vmatpush3.bf16.msra.mxu1 %v355_v7 }
  0x1d   :  { %341 = vmatpush3.bf16.msra.mxu0 %v357_v20 }
  0xd7   :  { %v108_v10 = vpop.f32.mrf.mxu0 }
  0xd8   :  { %v109_v11 = vadd.f32 %v291_v8, %v108_v10 }
  0xd9   :  { %v324_v12 = vpop.f32.mrf.mxu0 }
  0xda   :  { %v114_v13 = vmax.f32 %v109_v11, 0.0 }
  0xdb   :  { %v111_v14 = vpop.f32.mrf.mxu0 }
  0xdc   :  { %v117_v15 = vsel %vm116_vm2, %v114_v13, 0.0 }
  0xdd   :  { %v295_v16 = vadd.f32 -0.2, %v117_v15  ;;  %v325_v17 = vpop.f32.mrf.mxu0 }
  0xdf   :  { %v119_v18 = vpack.c.bf16 %v295_v16, %v295_v16 }
  0xe1   :  { %335 = vmatmul.mubr.msk.bf16.vlgmr.msra.gmra.mxu1 %vm159_vm3, %v119_v18 }
 0x1a1   :  { %v197_v23 = vpop.f32.mrf.mxu1 }
 0x1a2   :  { %v198_v24 = vadd.f32 %v296_v21, %v197_v23 }
 0x1a3   :  { %v336_v25 = vpop.f32.mrf.mxu1 }
 0x1a4   :  { %v203_v26 = vmax.f32 %v198_v24, 0.0 }
 0x1a5   :  { %v200_v27 = vpop.f32.mrf.mxu1 }
 0x1a6   :  { %v206_v28 = vsel %vm205_vm4, %v203_v26, 0.0 }
 0x1a7   :  { %v302_v29 = vadd.f32 -0.5, %v206_v28  ;;  %v337_v30 = vpop.f32.mrf.mxu1 }
 0x1a9   :  { %v208_v31 = vpack.c.bf16 %v302_v29, %v302_v29 }
 0x1ab   :  { %343 = vmatmul.mubr.msk.bf16.vlgmr.msra.gmra.mxu0 %vm70_vm1, %v208_v31 }
 0x26b   :  { %v269_v33 = vpop.f32.mrf.mxu0 }
 0x26c   :  { %v270_v34 = vadd.f32 %v303_v32, %v269_v33 }
 0x26d   :  { %v344_v35 = vpop.f32.mrf.mxu0 }
 0x26e   :  { %275 = vst [vmem:[#allocation5] sm:$0xff] %v270_v34 }
 0x26f   :  { %v272_v36 = vpop.f32.mrf.mxu0 }
 0x270   :  { %389 = shalt.err (!%p386_p9)
}
 0x271   :  { %285 = dma.vmem_to_hbm [thread:$0]  %s283_s13, 128, %s515_s9, [#allocation4]   ;;  %v345_v37 = vpop.f32.mrf.mxu0 }
 0x272   :  { %400 = dma.done.wait [#allocation4], 128  }
 0x273   :  { %401 = vsyncadd [#allocation4], 4294967168 }
 0x274   :  { %289 = vsyncpa [#allocation3], 1 }
 0x275   :  { %290 = vsyncpa [#allocation4], 1 }

</bundles_post_ra>
